<compile_context>
chip_gen: v5e
topology: v5e:2x2
jax: 0.10.0
libtpu: 0.0.40
codegen_flags: <defaults>
</compile_context>

<pallas_src>
import functools
import math

import numpy as np

import jax
import jax.numpy as jnp
from jax.experimental import pallas as pl
from jax.experimental.pallas import tpu as pltpu

LN_EPS = 1e-12                  # PositionalEmb builds LayerNorm(d_model, eps=1e-12)
_MiB = 1024 * 1024
_MAX_BLOCK_ROWS = 8192          # cap on (batch*patch) rows per block


def _tpu_info():
    """(vmem_capacity_bytes, tensorcores_per_chip) with conservative fallbacks."""
    vmem_cap = None
    kind = ""
    try:
        vmem_cap = int(pltpu.get_tpu_info().vmem_capacity_bytes)
    except Exception:
        pass
    try:
        kind = (jax.devices()[0].device_kind or "").lower()
    except Exception:
        pass
    n_cores = 2 if "v7" in kind else 1          # v7x: 2 TensorCores/chip; v5e/v6e: 1
    if vmem_cap is None:
        vmem_cap = 64 * _MiB                    # v7x-sized fallback is safe everywhere
    return vmem_cap, n_cores


def _vmem_budget_and_limit(vmem_cap):
    # Generation-aware block budget: v7x has 64 MiB/TC, v5e/v6e have 128 MiB.
    if vmem_cap <= 96 * _MiB:
        return 36 * _MiB, 48 * _MiB
    return 72 * _MiB, 96 * _MiB


def _pick_block(n_units, unit_elems, in_item, out_item, fixed_bytes, budget,
                max_units, align, n_cores):
    """Units per block along the (parallel) grid axis.

    Footprint model per unit: double-buffered input + output blocks plus ~5 full-tile
    f32 temporaries (f32 cast of x, centered diff, squared diff, scaled output, ...),
    so the enlarged budget stays safe.
    """
    per_unit = max(1, unit_elems * (2 * in_item + 2 * out_item + 5 * 4))
    t = (budget - fixed_bytes) // per_unit
    t = max(1, min(t, max_units, n_units))

    def _snap(v):
        # Keep the block's second-minor dim (8,128)-legal: a multiple of `align`,
        # or the full axis extent.
        if v >= n_units:
            return n_units
        if align > 1:
            v = (v // align) * align
            if v == 0:
                v = min(align, n_units)
        return max(1, v)

    t = _snap(t)

    # v7x megacore balance: give the "parallel" grid axis >=2 and an even number of
    # steps so both TensorCores get the same work.  Single-TC v5e/v6e skip this
    # entirely (splitting there only shrinks blocks and doubles per-step overhead).
    if n_cores >= 2 and n_units > 1:
        t = _snap(min(t, -(-n_units // 2)))
        step = align if align > 1 else 1
        while t > step and (-(-n_units // t)) % 2 != 0:
            t = _snap(t - step)
    return int(t)


def _posemb_ln_kernel(x_ref, add_ref, a_ref, b_ref, o_ref, *, scale, eps):
    # x_ref/o_ref: (tile_b, P, F) or (rows, F).  add_ref: (P, F) or (1, F) f32.
    # a_ref/b_ref: (1, F).  Broadcasting handles both ranks.
    x = x_ref[...].astype(jnp.float32)
    if scale != 1.0:                              # static (only mode == 'text' scales x)
        x = x * jnp.float32(scale)
    x = x + add_ref[...]                          # type embedding (+ sinusoidal term)

    f = x.shape[-1]
    mean = jnp.mean(x, axis=-1, keepdims=True)
    diff = x - mean
    # NOTE: torch.std default is the unbiased (N-1) divisor, and eps is added to std
    # (NOT sqrt(var+eps)) -- this intentionally matches the PyTorch module, do not "fix".
    var = jnp.sum(diff * diff, axis=-1, keepdims=True) * (1.0 / (f - 1))
    denom = jnp.sqrt(var) + eps                   # (..., 1)

    # EUP approximate reciprocal + one Newton refinement on the tiny per-row column:
    # full f32 accuracy without any per-element divide on the VPU.
    inv = pl.reciprocal(denom, approx=True)
    inv = inv * (2.0 - denom * inv)

    a = a_ref[...].astype(jnp.float32)            # (1, F) -> broadcasts over rows
    b = b_ref[...].astype(jnp.float32)
    o_ref[...] = (diff * inv * a + b).astype(o_ref.dtype)


def positional_emb_forward(x, type_pe_table, pe, a_2, b_2, *, mode=None, pos=0,
                           dropout_rate=0.0, eps=LN_EPS, alias_input=False,
                           max_block_rows=_MAX_BLOCK_ROWS):
    """Pallas TPU forward of PositionalEmb (eval-mode: dropout == identity)."""
    B, P, F = x.shape
    d_model = F
    in_item = jnp.dtype(x.dtype).itemsize
    out_item = in_item

    # Additive positional term (tiny; plain JAX -- no big HBM copies).  The CLS branch
    # has no pos_pe and is constant across the patch axis -> (1, F); img/text -> (P, F).
    type_row = type_pe_table[pos].astype(jnp.float32)[None, :]              # (1, F)
    if mode in ('img', 'img1', 'img2', 'text'):
        add = (type_row + pe[:P].astype(jnp.float32)).astype(jnp.float32)   # (P, F)
        scale = math.sqrt(d_model) if mode == 'text' else 1.0
    else:
        add = type_row.astype(jnp.float32)                                  # (1, F)
        scale = 1.0

    vmem_cap, n_cores = _tpu_info()
    budget, vmem_limit = _vmem_budget_and_limit(vmem_cap)
    fixed = 2 * int(add.size) * 4 + 4 * F * 4     # add block (double-buffered) + a/b

    kernel = functools.partial(_posemb_ln_kernel, scale=scale, eps=eps)
    a2 = a_2.reshape(1, F)
    b2 = b_2.reshape(1, F)
    alias = {0: 0} if alias_input else {}

    # CLS / P==1 path: `add` is patch-invariant, so squeeze to 2D for full sublane
    # packing (a (tile_b, 1, F) block wastes 7/8 of every vreg).
    use_2d = (add.shape[0] == 1)

    # NOTE: for production d_model not a multiple of 128 the writeback uses masked
    # partial-lane stores; prefer a lane-dense (128-multiple) d_model upstream.
    if use_2d:
        rows = B * P
        x_call = x.reshape(rows, F)
        tile = _pick_block(rows, F, in_item, out_item, fixed, budget,
                           max_block_rows, 8, n_cores)
        grid = pl.cdiv(rows, tile)
        in_specs = [
            pl.BlockSpec((tile, F), lambda i: (i, 0)),
            pl.BlockSpec((1, F), lambda i: (0, 0)),       # constant index: DMA'd once
            pl.BlockSpec((1, F), lambda i: (0, 0)),
            pl.BlockSpec((1, F), lambda i: (0, 0)),
        ]
        out_spec = pl.BlockSpec((tile, F), lambda i: (i, 0))
        out_shape = jax.ShapeDtypeStruct((rows, F), x.dtype)
    else:
        max_b = max(1, max_block_rows // P)
        tile = _pick_block(B, P * F, in_item, out_item, fixed, budget,
                           max_b, 1, n_cores)
        grid = pl.cdiv(B, tile)
        x_call = x
        in_specs = [
            pl.BlockSpec((tile, P, F), lambda i: (i, 0, 0)),
            pl.BlockSpec((P, F), lambda i: (0, 0)),       # constant index: DMA'd once
            pl.BlockSpec((1, F), lambda i: (0, 0)),
            pl.BlockSpec((1, F), lambda i: (0, 0)),
        ]
        out_spec = pl.BlockSpec((tile, P, F), lambda i: (i, 0, 0))
        out_shape = jax.ShapeDtypeStruct((B, P, F), x.dtype)

    out = pl.pallas_call(
        kernel,
        out_shape=out_shape,
        grid_spec=pltpu.PrefetchScalarGridSpec(
            num_scalar_prefetch=0,
            grid=(grid,),
            in_specs=in_specs,
            out_specs=out_spec,
        ),
        compiler_params=pltpu.CompilerParams(
            dimension_semantics=("parallel",),
            vmem_limit_bytes=int(vmem_limit),
        ),
        input_output_aliases=alias,
    )(x_call, add, a2, b2)

    if use_2d:
        out = out.reshape(B, P, F)

    # TODO(synk): nn.Dropout(p=dropout_rate) training-mode masking not implemented;
    # eval-mode dropout is the identity, which is what is returned here.
    del dropout_rate
    return out


def _build_pe_table(max_seq_len, d_model):
    # Exact replica of the PyTorch double loop (note the unusual 2*i / 2*(i+1) exponents).
    pe = np.zeros((max_seq_len, d_model), dtype=np.float32)
    pos = np.arange(max_seq_len, dtype=np.float64)[:, None]
    i = np.arange(0, d_model, 2, dtype=np.float64)[None, :]
    pe[:, 0::2] = np.sin(pos / 10000.0 ** (2.0 * i / d_model))
    pe[:, 1::2] = np.cos(pos / 10000.0 ** (2.0 * (i + 1.0) / d_model))
    return jnp.asarray(pe)


def _reference_forward(x, type_pe_table, pe, a_2, b_2, *, mode, pos, eps=LN_EPS):
    B, P, F = x.shape
    type_pe = type_pe_table[pos][None, None, :]
    if mode in ('img', 'img1', 'img2'):
        x = x + type_pe + pe[None, :P, :]
    elif mode == 'text':
        x = x * math.sqrt(F) + type_pe + pe[None, :P, :]
    else:
        x = x + type_pe
    mean = jnp.mean(x, axis=-1, keepdims=True)
    std = jnp.sqrt(jnp.sum((x - mean) ** 2, axis=-1, keepdims=True) / (F - 1))
    return a_2 * (x - mean) / (std + eps) + b_2


if __name__ == "__main__":
    d_model = 128                 # lane-dense feature dim (multiple of 128)
    batch, patch_len = 2, 8
    max_len, max_seq_len = 7, 200
    dropout_p = 0.1

    key = jax.random.PRNGKey(0)
    k_x, k_emb, k_cls, k_big, k_clsbig = jax.random.split(key, 5)

    x = jax.random.normal(k_x, (batch, patch_len, d_model), dtype=jnp.float32)
    x_cls = jax.random.normal(k_cls, (batch, 1, d_model), dtype=jnp.float32)
    x_big = jax.random.normal(k_big, (5, patch_len, d_model), dtype=jnp.float32)
    x_cls_big = jax.random.normal(k_clsbig, (20, 3, d_model), dtype=jnp.float32)

    # nn.Embedding(max_len, d_model) default init ~ N(0, 1)
    type_pe_table = jax.random.normal(k_emb, (max_len, d_model), dtype=jnp.float32)
    pe = _build_pe_table(max_seq_len, d_model)
    a_2 = jnp.ones((d_model,), dtype=jnp.float32)
    b_2 = jnp.zeros((d_model,), dtype=jnp.float32)

    cases = [
        (x, 'img', 1, None),          # 3D path, single block
        (x, 'text', 2, None),         # 3D path with sqrt(d_model) scaling
        (x_cls, None, 0, None),       # <CLS> branch: 2D sublane-dense path
        (x_big, 'img', 3, 8),         # forced multi-step 3D path
        (x_cls_big, None, 0, 16),     # forced multi-step 2D path, ragged last block
    ]
    for xi, mode, pos, cap in cases:
        kwargs = {} if cap is None else {'max_block_rows': cap}
        out = positional_emb_forward(xi, type_pe_table, pe, a_2, b_2,
                                     mode=mode, pos=pos, dropout_rate=dropout_p,
                                     **kwargs)
        out = jax.block_until_ready(out)
        ref = _reference_forward(xi, type_pe_table, pe, a_2, b_2, mode=mode, pos=pos)
        assert out.shape == xi.shape
        assert jnp.allclose(out, ref, atol=1e-4, rtol=1e-4), (
            mode, float(jnp.max(jnp.abs(out - ref))))

    print("KERNEL_OK")
</pallas_src>

<mosaic_0001>
module attributes {stable_mosaic.version = 11 : i64} {
  func.func @_posemb_ln_kernel(%arg0: i32, %arg1: memref<2x8x128xf32, #tpu.memory_space<vmem>>, %arg2: memref<8x128xf32, #tpu.memory_space<vmem>>, %arg3: memref<1x128xf32, #tpu.memory_space<vmem>>, %arg4: memref<1x128xf32, #tpu.memory_space<vmem>>, %arg5: memref<2x8x128xf32, #tpu.memory_space<vmem>>) attributes {dimension_semantics = [#tpu.dimension_semantics<parallel>], iteration_bounds = array<i64: 1>, scalar_prefetch = 0 : i64, scratch_operands = 0 : i64, tpu.core_type = #tpu.core_type<tc>, window_params = [{transform_indices = @transform_0, window_bounds = array<i64: 2, 8, 128>}, {pipeline_mode = #tpu.pipeline_mode<synchronous>, transform_indices = @transform_1, window_bounds = array<i64: 8, 128>}, {pipeline_mode = #tpu.pipeline_mode<synchronous>, transform_indices = @transform_2, window_bounds = array<i64: 1, 128>}, {pipeline_mode = #tpu.pipeline_mode<synchronous>, transform_indices = @transform_3, window_bounds = array<i64: 1, 128>}, {transform_indices = @transform_4, window_bounds = array<i64: 2, 8, 128>}]} {
    %c0 = arith.constant 0 : index
    %c0_0 = arith.constant 0 : index
    %c0_1 = arith.constant 0 : index
    %0 = vector.load %arg1[%c0, %c0_0, %c0_1] : memref<2x8x128xf32, #tpu.memory_space<vmem>>, vector<2x8x128xf32>
    %c0_2 = arith.constant 0 : index
    %c0_3 = arith.constant 0 : index
    %1 = vector.load %arg2[%c0_2, %c0_3] : memref<8x128xf32, #tpu.memory_space<vmem>>, vector<8x128xf32>
    %2 = vector.shape_cast %1 : vector<8x128xf32> to vector<1x8x128xf32>
    %3 = vector.broadcast %2 : vector<1x8x128xf32> to vector<2x8x128xf32>
    %4 = arith.addf %0, %3 : vector<2x8x128xf32>
    %cst = arith.constant dense<0.000000e+00> : vector<2x8xf32>
    %5 = vector.multi_reduction <add>, %4, %cst [2] : vector<2x8x128xf32> to vector<2x8xf32>
    %6 = vector.shape_cast %5 : vector<2x8xf32> to vector<2x8x1xf32>
    %cst_4 = arith.constant 1.280000e+02 : f32
    %7 = vector.broadcast %cst_4 : f32 to vector<2x8x1xf32>
    %8 = arith.divf %6, %7 : vector<2x8x1xf32>
    %9 = vector.broadcast %8 : vector<2x8x1xf32> to vector<2x8x128xf32>
    %10 = arith.subf %4, %9 : vector<2x8x128xf32>
    %11 = arith.mulf %10, %10 : vector<2x8x128xf32>
    %cst_5 = arith.constant dense<0.000000e+00> : vector<2x8xf32>
    %12 = vector.multi_reduction <add>, %11, %cst_5 [2] : vector<2x8x128xf32> to vector<2x8xf32>
    %13 = vector.shape_cast %12 : vector<2x8xf32> to vector<2x8x1xf32>
    %cst_6 = arith.constant 0.00787401571 : f32
    %14 = vector.broadcast %cst_6 : f32 to vector<2x8x1xf32>
    %15 = arith.mulf %13, %14 : vector<2x8x1xf32>
    %16 = math.sqrt %15 : vector<2x8x1xf32>
    %cst_7 = arith.constant 9.99999996E-13 : f32
    %17 = vector.broadcast %cst_7 : f32 to vector<2x8x1xf32>
    %18 = arith.addf %16, %17 : vector<2x8x1xf32>
    %19 = tpu.reciprocal %18 {approx = true} : vector<2x8x1xf32> -> vector<2x8x1xf32>
    %20 = arith.mulf %18, %19 : vector<2x8x1xf32>
    %cst_8 = arith.constant 2.000000e+00 : f32
    %21 = vector.broadcast %cst_8 : f32 to vector<2x8x1xf32>
    %22 = arith.subf %21, %20 : vector<2x8x1xf32>
    %23 = arith.mulf %19, %22 : vector<2x8x1xf32>
    %c0_9 = arith.constant 0 : index
    %c0_10 = arith.constant 0 : index
    %24 = vector.load %arg3[%c0_9, %c0_10] : memref<1x128xf32, #tpu.memory_space<vmem>>, vector<1x128xf32>
    %c0_11 = arith.constant 0 : index
    %c0_12 = arith.constant 0 : index
    %25 = vector.load %arg4[%c0_11, %c0_12] : memref<1x128xf32, #tpu.memory_space<vmem>>, vector<1x128xf32>
    %26 = vector.broadcast %23 : vector<2x8x1xf32> to vector<2x8x128xf32>
    %27 = arith.mulf %10, %26 : vector<2x8x128xf32>
    %28 = vector.shape_cast %24 : vector<1x128xf32> to vector<1x1x128xf32>
    %29 = vector.broadcast %28 : vector<1x1x128xf32> to vector<2x8x128xf32>
    %30 = arith.mulf %27, %29 : vector<2x8x128xf32>
    %31 = vector.shape_cast %25 : vector<1x128xf32> to vector<1x1x128xf32>
    %32 = vector.broadcast %31 : vector<1x1x128xf32> to vector<2x8x128xf32>
    %33 = arith.addf %30, %32 : vector<2x8x128xf32>
    %c0_13 = arith.constant 0 : index
    %c0_14 = arith.constant 0 : index
    %c0_15 = arith.constant 0 : index
    %34 = vector.load %arg5[%c0_13, %c0_14, %c0_15] : memref<2x8x128xf32, #tpu.memory_space<vmem>>, vector<2x8x128xf32>
    tpu.vector_store %arg5[%c0_13, %c0_14, %c0_15], %33 {strides = array<i32>} : memref<2x8x128xf32, #tpu.memory_space<vmem>>, vector<2x8x128xf32>,
    return
  }
  func.func @transform_0(%arg0: i32) -> (i32, i32, i32) {
    %c0_i32 = arith.constant 0 : i32
    %c0_i32_0 = arith.constant 0 : i32
    %c0_i32_1 = arith.constant 0 : i32
    return %arg0, %c0_i32, %c0_i32_0 : i32, i32, i32
  }
  func.func @transform_1(%arg0: i32) -> (i32, i32) {
    %c0_i32 = arith.constant 0 : i32
    %c0_i32_0 = arith.constant 0 : i32
    %c0_i32_1 = arith.constant 0 : i32
    return %c0_i32, %c0_i32_0 : i32, i32
  }
  func.func @transform_2(%arg0: i32) -> (i32, i32) {
    %c0_i32 = arith.constant 0 : i32
    %c0_i32_0 = arith.constant 0 : i32
    %c0_i32_1 = arith.constant 0 : i32
    return %c0_i32, %c0_i32_0 : i32, i32
  }
  func.func @transform_3(%arg0: i32) -> (i32, i32) {
    %c0_i32 = arith.constant 0 : i32
    %c0_i32_0 = arith.constant 0 : i32
    %c0_i32_1 = arith.constant 0 : i32
    return %c0_i32, %c0_i32_0 : i32, i32
  }
  func.func @transform_4(%arg0: i32) -> (i32, i32, i32) {
    %c0_i32 = arith.constant 0 : i32
    %c0_i32_0 = arith.constant 0 : i32
    %c0_i32_1 = arith.constant 0 : i32
    return %arg0, %c0_i32, %c0_i32_0 : i32, i32, i32
  }
}

</mosaic_0001>

<bundles_post_ra>
// kernel: tpu_custom_call.1
= control target key start
LH: loop header
LB: loop body
LE: loop exit
PB: predicated region body
PF: predicated region fallthrough
CT: control target
= control target key end

     0   :  { %9 = vsyncpa [#allocation3], 0  ;;  %s294_s0 = inlined_call_operand.hbm [shape: f32[2,8,128], index: 0, kind: input, shape index: {}]   ;;  %s295_s1 = inlined_call_operand.hbm [shape: f32[8,128], index: 1, kind: input, shape index: {}]   ;;  %s296_s2 = inlined_call_operand.vmem [shape: f32[1,128], index: 2, kind: input, shape index: {}]   ;;  %s297_s3 = inlined_call_operand.vmem [shape: f32[1,128], index: 3, kind: input, shape index: {}]   ;;  %s298_s4 = inlined_call_operand.hbm [shape: f32[2,8,128], index: 4, kind: output, shape index: {}]  }
   0x1   :  { %10 = vsyncpa [#allocation6], 0 }
   0x2   :  { %11 = vsyncpa [#allocation4], 0  ;;  %s16_s17 = sshll.u32 %s294_s0, 4  ;;  %s242_s18 = smov [#allocation2]   ;;  %s17_s17 = int_to_ptr.hbm [resolvable:$true] %s16_s17 }
   0x3   :  { %s18_s19 = sshll.u32 %s242_s18, 4  ;;  %s30_s22 = sshll.u32 %s295_s1, 4  ;;  %s19_s19 = int_to_ptr.vmem [resolvable:$true] %s18_s19  ;;  %s31_s22 = int_to_ptr.hbm [resolvable:$true] %s30_s22 }
   0x4   :  { %s243_s23 = smov 128   ;;  %s244_s24 = smov 8  }
   0x5   :  { %24 = dma.hbm_to_vmem [thread:$0]  %s17_s17, 256, %s19_s19, [#allocation3], %s243_s23, %s243_s23, %s244_s24  }
   0x6   :  { %s245_s25 = smov [#allocation5]  }
   0x7   :  { %s32_s26 = sshll.u32 %s245_s25, 4  ;;  %s33_s26 = int_to_ptr.vmem [resolvable:$true] %s32_s26 }
   0x8   :  { %35 = dma.hbm_to_vmem [thread:$0]  %s31_s22, 128, %s33_s26, [#allocation6]  }
   0x9   :  { %236 = dma.done.wait [#allocation3], 256  }
   0xa   :  { %237 = vsyncadd [#allocation3], 4294967040 }
   0xb   :  { %238 = dma.done.wait [#allocation6], 128  }
   0xc   :  { %239 = vsyncadd [#allocation6], 4294967168  ;;  %v48_v0 = vld [vmem:[#allocation2] sm:$0xff]  ;;  %v50_v1 = vld [vmem:[#allocation5] sm:$0xff]  ;;  %v246_v5 = vmov 128.0   ;;  %s247_s29 = smov [#allocation7]  }
   0xd   :  { %v51_v2 = vadd.f32 %v50_v1, %v48_v0  ;;  %v49_v3 = vld [vmem:[#allocation2 + $0x8] sm:$0xff]  ;;  %154 = vrcp.f32 %v246_v5  ;;  %v152_v50 = vld [vmem:[%s296_s2] ss:$0 sm:$0xff]  ;;  %s130_s30 = sshll.u32 %s247_s29, 4  ;;  %s132_s7 = sshll.u32 %s298_s4, 4  ;;  %s131_s30 = int_to_ptr.vmem [resolvable:$true] %s130_s30  ;;  %s133_s7 = int_to_ptr.hbm [resolvable:$true] %s132_s7 }
   0xe   :  { %v52_v4 = vadd.f32 %v50_v1, %v49_v3  ;;  %v153_v52 = vld [vmem:[%s297_s3] ss:$0 sm:$0xff] }
   0xf   :  { %53 = vadd.xlane.f32.xlu0 %v51_v2 }
  0x13   :  { %v155_v6 = vpop.eup %154 }
  0x14   :  { %v58_v7 = vmul.f32 128.0, %v155_v6  ;;  %vm62_vm0 = vweird.f32 %v155_v6 }
  0x16   :  { %v59_v8 = vsub.f32 1.0, %v58_v7 }
  0x17   :  { %55 = vadd.xlane.f32.xlu0 %v52_v4 }
  0x18   :  { %v60_v9 = vmul.f32 %v155_v6, %v59_v8 }
  0x1a   :  { %v61_v10 = vadd.f32 %v155_v6, %v60_v9 }
  0x1c   :  { %v63_v11 = vsel %vm62_vm0, %v155_v6, %v61_v10 }
  0x82   :  { %v54_v12 = vpop.xlane.xlu0 %53 }
  0x83   :  { %v64_v13 = vmul.f32 %v63_v11, %v54_v12 }
  0x85   :  { %v66_v14 = vsub.f32 %v51_v2, %v64_v13 }
  0x87   :  { %v68_v15 = vmul.f32 %v66_v14, %v66_v14 }
  0x89   :  { %70 = vadd.xlane.f32.xlu1 %v68_v15 }
  0x8a   :  { %v56_v16 = vpop.xlane.xlu0 %55 }
  0x8b   :  { %v65_v17 = vmul.f32 %v63_v11, %v56_v16 }
  0x8d   :  { %v67_v18 = vsub.f32 %v52_v4, %v65_v17 }
  0x8f   :  { %v69_v19 = vmul.f32 %v67_v18, %v67_v18 }
  0x91   :  { %72 = vadd.xlane.f32.xlu1 %v69_v19 }
  0xfc   :  { %v71_v20 = vpop.xlane.xlu1 %70 }
  0xfd   :  { %v74_v21 = vmul.f32 0.007874016, %v71_v20 }
  0xff   :  { %156 = vrsqrt.f32 %v74_v21  ;;  %vm83_vm1 = vcmp.eq.f32.partialorder %v74_v21, inf  ;;  %v86_v34 = vand.u32 2147483648, %v74_v21  ;;  %vm85_vm2 = vcmp.eq.f32.partialorder %v74_v21, 0.0 }
 0x104   :  { %v73_v22 = vpop.xlane.xlu1 %72 }
 0x105   :  { %v157_v23 = vpop.eup %156  ;;  %v75_v24 = vmul.f32 0.007874016, %v73_v22 }
 0x106   :  { %v77_v25 = vmul.f32 %v157_v23, %v74_v21 }
 0x107   :  { %158 = vrsqrt.f32 %v75_v24  ;;  %vm95_vm3 = vcmp.eq.f32.partialorder %v75_v24, inf  ;;  %v98_v42 = vand.u32 2147483648, %v75_v24  ;;  %vm97_vm4 = vcmp.eq.f32.partialorder %v75_v24, 0.0 }
 0x108   :  { %v78_v26 = vmul.f32 %v157_v23, %v77_v25 }
 0x10a   :  { %v79_v27 = vmul.f32 0.5, %v78_v26 }
 0x10c   :  { %v80_v28 = vsub.f32 1.5, %v79_v27 }
 0x10d   :  { %v159_v29 = vpop.eup %158 }
 0x10e   :  { %v81_v30 = vmul.f32 %v157_v23, %v80_v28  ;;  %v89_v31 = vmul.f32 %v159_v29, %v75_v24 }
 0x110   :  { %v82_v32 = vmul.f32 %v81_v30, %v74_v21  ;;  %v90_v33 = vmul.f32 %v159_v29, %v89_v31 }
 0x112   :  { %v91_v35 = vmul.f32 0.5, %v90_v33  ;;  %v84_v36 = vsel %vm83_vm1, %v74_v21, %v82_v32 }
 0x113   :  { %v87_v37 = vsel %vm85_vm2, %v86_v34, %v84_v36 }
 0x114   :  { %v92_v38 = vsub.f32 1.5, %v91_v35  ;;  %v100_v39 = vadd.f32 1e-12, %v87_v37 }
 0x116   :  { %v93_v40 = vmul.f32 %v159_v29, %v92_v38  ;;  %160 = vrcp.f32 %v100_v39 }
 0x118   :  { %v94_v41 = vmul.f32 %v93_v40, %v75_v24 }
 0x11a   :  { %v96_v43 = vsel %vm95_vm3, %v75_v24, %v94_v41 }
 0x11b   :  { %v99_v44 = vsel %vm97_vm4, %v98_v42, %v96_v43 }
 0x11c   :  { %v161_v45 = vpop.eup %160  ;;  %v101_v46 = vadd.f32 1e-12, %v99_v44 }
 0x11d   :  { %v104_v47 = vmul.f32 %v161_v45, %v100_v39 }
 0x11e   :  { %162 = vrcp.f32 %v101_v46 }
 0x11f   :  { %v106_v48 = vsub.f32 2.0, %v104_v47 }
 0x121   :  { %v108_v49 = vmul.f32 %v161_v45, %v106_v48 }
 0x123   :  { %v112_v51 = vmul.f32 %v108_v49, %v66_v14 }
 0x124   :  { %v163_v53 = vpop.eup %162 }
 0x125   :  { %v105_v54 = vmul.f32 %v163_v53, %v101_v46  ;;  %v117_v55 = vmul.f32 %v152_v50, %v112_v51 }
 0x127   :  { %v107_v56 = vsub.f32 2.0, %v105_v54  ;;  %v122_v57 = vadd.f32 %v153_v52, %v117_v55 }
 0x129   :  { %v109_v58 = vmul.f32 %v163_v53, %v107_v56  ;;  %124 = vst [vmem:[#allocation7] sm:$0xff] %v122_v57 }
 0x12b   :  { %v113_v59 = vmul.f32 %v109_v58, %v67_v18 }
 0x12d   :  { %v118_v60 = vmul.f32 %v152_v50, %v113_v59 }
 0x12f   :  { %v123_v61 = vadd.f32 %v153_v52, %v118_v60 }
 0x131   :  { %125 = vst [vmem:[#allocation7 + $0x8] sm:$0xff] %v123_v61 }
 0x132   :  { %138 = dma.vmem_to_hbm [thread:$0]  %s131_s30, 256, %s133_s7, [#allocation4], %s243_s23, %s243_s23, %s244_s24  }
 0x133   :  { %240 = dma.done.wait [#allocation4], 256  }
 0x134   :  { %241 = vsyncadd [#allocation4], 4294967040 }
 0x135   :  { %143 = vsyncpa [#allocation3], 1 }
 0x136   :  { %144 = vsyncpa [#allocation6], 1 }
 0x137   :  { %145 = vsyncpa [#allocation4], 1 }

</bundles_post_ra>
